<compile_context>
chip_gen: v5e
topology: v5e:2x2
jax: 0.10.0
libtpu: 0.0.40
codegen_flags: <defaults>
</compile_context>

<pallas_src>
import functools

import jax
import jax.numpy as jnp
import numpy as np
from jax import lax
from jax.experimental import pallas as pl
from jax.experimental.pallas import tpu as pltpu


_VMEM_BUDGET = 48 * 1024 * 1024   # headroom under v7x's 64 MiB physical VMEM


# ----------------------------------------------------------------------------
# Kernel A (preferred): W fully VMEM-resident, no K grid axis.
#   out = LayerNorm( x @ W + b + residual )
# ----------------------------------------------------------------------------
def _self_output_kernel_resident(x_ref, w_ref, b_ref, res_ref, g_ref, beta_ref,
                                 o_ref, *, eps):
    # bf16 operands feed the MXU at native throughput; f32 accumulation.
    x = x_ref[...].astype(jnp.bfloat16)
    w = w_ref[...].astype(jnp.bfloat16)      # already bf16 (prepared once)
    y = jnp.dot(x, w, preferred_element_type=jnp.float32)

    # TODO(synk): nn.Dropout is identity in eval mode; training-mode dropout
    # would use pltpu.prng_seed / pltpu.prng_random_bits here.
    z = y + b_ref[...].astype(jnp.float32) + res_ref[...].astype(jnp.float32)

    # LayerNorm over hidden dim (biased variance, like torch.nn.LayerNorm).
    mean = jnp.mean(z, axis=-1, keepdims=True)
    zc = z - mean
    var = jnp.mean(zc * zc, axis=-1, keepdims=True)
    inv = lax.rsqrt(var + eps)                                      # EUP slot
    out = zc * inv * g_ref[...].astype(jnp.float32) \
          + beta_ref[...].astype(jnp.float32)
    o_ref[...] = out.astype(o_ref.dtype)


# ----------------------------------------------------------------------------
# Kernel B (fallback for very large C): K-tiled matmul with f32 accumulator.
#   grid = (M tiles, K tiles);  K is the contraction axis (last, "arbitrary").
# ----------------------------------------------------------------------------
def _self_output_kernel_ktiled(x_ref, w_ref, b_ref, res_ref, g_ref, beta_ref,
                               o_ref, acc_ref, *, eps):
    k = pl.program_id(1)

    @pl.when(k == 0)
    def _():
        acc_ref[...] = jnp.zeros_like(acc_ref)

    acc_ref[...] += jnp.dot(x_ref[...].astype(jnp.bfloat16),
                            w_ref[...].astype(jnp.bfloat16),
                            preferred_element_type=jnp.float32)

    @pl.when(k == pl.num_programs(1) - 1)
    def _():
        z = acc_ref[...] + b_ref[...].astype(jnp.float32) \
            + res_ref[...].astype(jnp.float32)
        mean = jnp.mean(z, axis=-1, keepdims=True)
        zc = z - mean
        var = jnp.mean(zc * zc, axis=-1, keepdims=True)
        inv = lax.rsqrt(var + eps)                                  # EUP slot
        out = zc * inv * g_ref[...].astype(jnp.float32) \
              + beta_ref[...].astype(jnp.float32)
        o_ref[...] = out.astype(o_ref.dtype)


# ----------------------------------------------------------------------------
# One-time parameter preparation (static): pre-transpose W to (C_in, C_out)
# and cast it to bf16 so no per-forward XLA transpose/cast is emitted and the
# HBM / VMEM footprint of W is halved.
# ----------------------------------------------------------------------------
def prepare_params(params, matmul_dtype=jnp.bfloat16):
    C = params["dense_b"].shape[0]
    return {
        "w": jnp.asarray(params["dense_w"]).T.astype(matmul_dtype),  # (Cin,Cout)
        "b": jnp.asarray(params["dense_b"]).reshape(1, C),
        "g": jnp.asarray(params["ln_w"]).reshape(1, C),
        "beta": jnp.asarray(params["ln_b"]).reshape(1, C),
    }


def _pick_tile(dim, candidates):
    """Largest candidate tile that evenly divides `dim`, else the full dim."""
    for c in candidates:
        if dim >= c and dim % c == 0:
            return c
    return dim


def custom_self_output_forward(hidden_states, input_tensor, prepared,
                               eps=1e-12, *, force_k_tiled=False,
                               tk_override=None):
    """hidden_states, input_tensor: (B, T, C).  `prepared` = prepare_params(...)."""
    B, T, C = hidden_states.shape
    N = B * T

    x = hidden_states.reshape(N, C)
    res = input_tensor.reshape(N, C)
    w, b, g, beta = prepared["w"], prepared["b"], prepared["g"], prepared["beta"]

    x_item = x.dtype.itemsize
    r_item = res.dtype.itemsize
    w_item = w.dtype.itemsize
    o_item = jnp.dtype(hidden_states.dtype).itemsize

    # ---- variant selection under the VMEM budget ---------------------------
    w_buf_bytes = 2 * C * C * w_item                     # resident W, 2 buffers
    use_resident_w = (not force_k_tiled) and (w_buf_bytes <= _VMEM_BUDGET // 2)

    if use_resident_w:
        tk = C
        w_vmem = w_buf_bytes
        acc_row_bytes = 0                                # no accumulator scratch
    else:
        tk = (tk_override if (tk_override and C % tk_override == 0)
              else _pick_tile(C, (512, 256, 128)))
        w_vmem = 2 * tk * C * w_item
        acc_row_bytes = 4 * C                            # f32 accumulator scratch

    def m_bytes(t):
        # double-buffered x / residual / output blocks + accumulator scratch
        x_blk = t * (C if use_resident_w else tk) * x_item
        return 2 * (x_blk + t * C * r_item + t * C * o_item) + t * acc_row_bytes

    # Row tile: start large (v5e/v6e reuse), shrink until the blocks fit the
    # per-M-tile budget and the "parallel" M axis has >= 2 tiles (v7x megacore).
    m_budget = _VMEM_BUDGET - w_vmem
    tm = _pick_tile(N, (1024, 512, 256, 128, 64, 32, 16, 8))
    while (tm > 8 and tm % 2 == 0 and N % (tm // 2) == 0
           and (m_bytes(tm) > m_budget or N // tm < 2)):
        tm //= 2

    # Explicit scoped-VMEM limit sized from the actual block footprint.
    param_vmem = 2 * 3 * C * 4                           # bias/gamma/beta blocks
    need = m_bytes(tm) + w_vmem + param_vmem
    vmem_limit = int(min(max(1.25 * need + (1 << 20), 16 * 1024 * 1024),
                         64 * 1024 * 1024))

    # Advisory cost (real W traffic + real itemsizes).
    w_traffic = C * C * w_item if use_resident_w else (N // tm) * C * C * w_item
    cost = pl.CostEstimate(
        flops=2 * N * C * C + 10 * N * C,
        transcendentals=N,                               # one rsqrt per row
        bytes_accessed=int(N * C * (x_item + r_item + o_item)
                           + w_traffic + 3 * C * 4),
    )

    if use_resident_w:
        kernel = functools.partial(_self_output_kernel_resident, eps=eps)
        grid = (N // tm,)
        in_specs = [
            pl.BlockSpec((tm, C), lambda i: (i, 0)),     # x tile
            pl.BlockSpec((C, C), lambda i: (0, 0)),      # W (VMEM-resident)
            pl.BlockSpec((1, C), lambda i: (0, 0)),      # bias
            pl.BlockSpec((tm, C), lambda i: (i, 0)),     # residual
            pl.BlockSpec((1, C), lambda i: (0, 0)),      # LN gamma
            pl.BlockSpec((1, C), lambda i: (0, 0)),      # LN beta
        ]
        out_specs = pl.BlockSpec((tm, C), lambda i: (i, 0))
        scratch_shapes = []
        dim_sem = ("parallel",)
    else:
        kernel = functools.partial(_self_output_kernel_ktiled, eps=eps)
        grid = (N // tm, C // tk)
        in_specs = [
            pl.BlockSpec((tm, tk), lambda i, k: (i, k)),  # x tile
            pl.BlockSpec((tk, C), lambda i, k: (k, 0)),   # W tile
            pl.BlockSpec((1, C), lambda i, k: (0, 0)),    # bias
            pl.BlockSpec((tm, C), lambda i, k: (i, 0)),   # residual
            pl.BlockSpec((1, C), lambda i, k: (0, 0)),    # LN gamma
            pl.BlockSpec((1, C), lambda i, k: (0, 0)),    # LN beta
        ]
        out_specs = pl.BlockSpec((tm, C), lambda i, k: (i, 0))
        scratch_shapes = [pltpu.VMEM((tm, C), jnp.float32)]
        dim_sem = ("parallel", "arbitrary")

    out = pl.pallas_call(
        kernel,
        out_shape=jax.ShapeDtypeStruct((N, C), hidden_states.dtype),
        grid=grid,
        in_specs=in_specs,
        out_specs=out_specs,
        scratch_shapes=scratch_shapes,
        compiler_params=pltpu.CompilerParams(
            dimension_semantics=dim_sem,
            vmem_limit_bytes=vmem_limit),
        cost_estimate=cost,
    )(x, w, b, res, g, beta)

    return out.reshape(B, T, C)


# ----------------------------------------------------------------------------
# Pure-JAX reference (f32 everywhere), for correctness checking.
# ----------------------------------------------------------------------------
def reference_forward(hidden_states, input_tensor, params, eps=1e-12):
    y = hidden_states @ params["dense_w"].T + params["dense_b"]
    z = y + input_tensor
    mean = jnp.mean(z, axis=-1, keepdims=True)
    var = jnp.mean((z - mean) ** 2, axis=-1, keepdims=True)
    return (z - mean) * lax.rsqrt(var + eps) * params["ln_w"] + params["ln_b"]


if __name__ == "__main__":
    eps = 1e-12
    key = jax.random.PRNGKey(0)

    def run_case(B, T, C, force_k_tiled=False, tk_override=None):
        k1, k2, k3 = jax.random.split(jax.random.fold_in(key, C), 3)
        params = {
            "dense_w": 0.05 * jax.random.normal(k1, (C, C), jnp.float32),
            "dense_b": 0.1 * jnp.sin(jnp.arange(C, dtype=jnp.float32)),
            "ln_w": 1.0 + 0.1 * jnp.cos(jnp.arange(C, dtype=jnp.float32)),
            "ln_b": 0.05 * jnp.sin(0.5 * jnp.arange(C, dtype=jnp.float32)),
        }
        hidden_states = jax.random.normal(k2, (B, T, C), jnp.float32)
        input_tensor = jax.random.normal(k3, (B, T, C), jnp.float32)

        prepared = prepare_params(params)   # one-time transpose + bf16 cast
        out = custom_self_output_forward(
            hidden_states, input_tensor, prepared, eps,
            force_k_tiled=force_k_tiled, tk_override=tk_override)
        out = jax.block_until_ready(out)

        ref = reference_forward(hidden_states, input_tensor, params, eps)
        # Tolerance loosened for bf16 MXU operands (accumulation stays f32).
        np.testing.assert_allclose(np.asarray(out), np.asarray(ref),
                                   rtol=2e-2, atol=2e-2)

    # Small shapes consistent with the module (batch=2, seq=8, hidden=32):
    # exercises the resident-W (single matmul per M tile) path.
    run_case(B=2, T=8, C=32)

    # Also exercise the (8,128)-tiled, K-accumulating fallback path.
    run_case(B=2, T=64, C=256, force_k_tiled=True, tk_override=128)

    print("KERNEL_OK")
</pallas_src>

<mosaic_0001>
module attributes {stable_mosaic.version = 11 : i64} {
  func.func @_self_output_kernel_resident(%arg0: i32, %arg1: memref<8x32xf32, #tpu.memory_space<vmem>>, %arg2: memref<32x32xbf16, #tpu.memory_space<vmem>>, %arg3: memref<1x32xf32, #tpu.memory_space<vmem>>, %arg4: memref<8x32xf32, #tpu.memory_space<vmem>>, %arg5: memref<1x32xf32, #tpu.memory_space<vmem>>, %arg6: memref<1x32xf32, #tpu.memory_space<vmem>>, %arg7: memref<8x32xf32, #tpu.memory_space<vmem>>) attributes {dimension_semantics = [#tpu.dimension_semantics<parallel>], iteration_bounds = array<i64: 2>, scalar_prefetch = 0 : i64, scratch_operands = 0 : i64, tpu.core_type = #tpu.core_type<tc>, window_params = [{transform_indices = @transform_0, window_bounds = array<i64: 8, 32>}, {pipeline_mode = #tpu.pipeline_mode<synchronous>, transform_indices = @transform_1, window_bounds = array<i64: 32, 32>}, {pipeline_mode = #tpu.pipeline_mode<synchronous>, transform_indices = @transform_2, window_bounds = array<i64: 1, 32>}, {transform_indices = @transform_3, window_bounds = array<i64: 8, 32>}, {pipeline_mode = #tpu.pipeline_mode<synchronous>, transform_indices = @transform_4, window_bounds = array<i64: 1, 32>}, {pipeline_mode = #tpu.pipeline_mode<synchronous>, transform_indices = @transform_5, window_bounds = array<i64: 1, 32>}, {transform_indices = @transform_6, window_bounds = array<i64: 8, 32>}]} {
    %c0 = arith.constant 0 : index
    %c0_0 = arith.constant 0 : index
    %0 = vector.load %arg1[%c0, %c0_0] : memref<8x32xf32, #tpu.memory_space<vmem>>, vector<8x32xf32>
    %1 = arith.truncf %0 : vector<8x32xf32> to vector<8x32xbf16>
    %c0_1 = arith.constant 0 : index
    %c0_2 = arith.constant 0 : index
    %2 = vector.load %arg2[%c0_1, %c0_2] : memref<32x32xbf16, #tpu.memory_space<vmem>>, vector<32x32xbf16>
    %cst = arith.constant dense<0.000000e+00> : vector<8x32xf32>
    %3 = tpu.matmul %1, %2, %cst {dimension_numbers = #tpu.dot_dimension_numbers<[1], [0], [0], [1], [0, 0, 1, 1], [], []>} : vector<8x32xbf16>, vector<32x32xbf16>, vector<8x32xf32> -> vector<8x32xf32>
    %c0_3 = arith.constant 0 : index
    %c0_4 = arith.constant 0 : index
    %4 = vector.load %arg3[%c0_3, %c0_4] : memref<1x32xf32, #tpu.memory_space<vmem>>, vector<1x32xf32>
    %5 = vector.broadcast %4 : vector<1x32xf32> to vector<8x32xf32>
    %6 = arith.addf %3, %5 : vector<8x32xf32>
    %c0_5 = arith.constant 0 : index
    %c0_6 = arith.constant 0 : index
    %7 = vector.load %arg4[%c0_5, %c0_6] : memref<8x32xf32, #tpu.memory_space<vmem>>, vector<8x32xf32>
    %8 = arith.addf %6, %7 : vector<8x32xf32>
    %cst_7 = arith.constant dense<0.000000e+00> : vector<8xf32>
    %9 = vector.multi_reduction <add>, %8, %cst_7 [1] : vector<8x32xf32> to vector<8xf32>
    %10 = vector.shape_cast %9 : vector<8xf32> to vector<8x1xf32>
    %cst_8 = arith.constant 3.200000e+01 : f32
    %11 = vector.broadcast %cst_8 : f32 to vector<8x1xf32>
    %12 = arith.divf %10, %11 : vector<8x1xf32>
    %13 = vector.broadcast %12 : vector<8x1xf32> to vector<8x32xf32>
    %14 = arith.subf %8, %13 : vector<8x32xf32>
    %15 = arith.mulf %14, %14 : vector<8x32xf32>
    %cst_9 = arith.constant dense<0.000000e+00> : vector<8xf32>
    %16 = vector.multi_reduction <add>, %15, %cst_9 [1] : vector<8x32xf32> to vector<8xf32>
    %17 = vector.shape_cast %16 : vector<8xf32> to vector<8x1xf32>
    %cst_10 = arith.constant 3.200000e+01 : f32
    %18 = vector.broadcast %cst_10 : f32 to vector<8x1xf32>
    %19 = arith.divf %17, %18 : vector<8x1xf32>
    %cst_11 = arith.constant 9.99999996E-13 : f32
    %20 = vector.broadcast %cst_11 : f32 to vector<8x1xf32>
    %21 = arith.addf %19, %20 : vector<8x1xf32>
    %22 = math.rsqrt %21 : vector<8x1xf32>
    %23 = vector.broadcast %22 : vector<8x1xf32> to vector<8x32xf32>
    %24 = arith.mulf %14, %23 : vector<8x32xf32>
    %c0_12 = arith.constant 0 : index
    %c0_13 = arith.constant 0 : index
    %25 = vector.load %arg5[%c0_12, %c0_13] : memref<1x32xf32, #tpu.memory_space<vmem>>, vector<1x32xf32>
    %26 = vector.broadcast %25 : vector<1x32xf32> to vector<8x32xf32>
    %27 = arith.mulf %24, %26 : vector<8x32xf32>
    %c0_14 = arith.constant 0 : index
    %c0_15 = arith.constant 0 : index
    %28 = vector.load %arg6[%c0_14, %c0_15] : memref<1x32xf32, #tpu.memory_space<vmem>>, vector<1x32xf32>
    %29 = vector.broadcast %28 : vector<1x32xf32> to vector<8x32xf32>
    %30 = arith.addf %27, %29 : vector<8x32xf32>
    %c0_16 = arith.constant 0 : index
    %c0_17 = arith.constant 0 : index
    %31 = vector.load %arg7[%c0_16, %c0_17] : memref<8x32xf32, #tpu.memory_space<vmem>>, vector<8x32xf32>
    tpu.vector_store %arg7[%c0_16, %c0_17], %30 {strides = array<i32>} : memref<8x32xf32, #tpu.memory_space<vmem>>, vector<8x32xf32>,
    return
  }
  func.func @transform_0(%arg0: i32) -> (i32, i32) {
    %c0_i32 = arith.constant 0 : i32
    %c0_i32_0 = arith.constant 0 : i32
    return %arg0, %c0_i32 : i32, i32
  }
  func.func @transform_1(%arg0: i32) -> (i32, i32) {
    %c0_i32 = arith.constant 0 : i32
    %c0_i32_0 = arith.constant 0 : i32
    %c0_i32_1 = arith.constant 0 : i32
    return %c0_i32, %c0_i32_0 : i32, i32
  }
  func.func @transform_2(%arg0: i32) -> (i32, i32) {
    %c0_i32 = arith.constant 0 : i32
    %c0_i32_0 = arith.constant 0 : i32
    %c0_i32_1 = arith.constant 0 : i32
    return %c0_i32, %c0_i32_0 : i32, i32
  }
  func.func @transform_3(%arg0: i32) -> (i32, i32) {
    %c0_i32 = arith.constant 0 : i32
    %c0_i32_0 = arith.constant 0 : i32
    return %arg0, %c0_i32 : i32, i32
  }
  func.func @transform_4(%arg0: i32) -> (i32, i32) {
    %c0_i32 = arith.constant 0 : i32
    %c0_i32_0 = arith.constant 0 : i32
    %c0_i32_1 = arith.constant 0 : i32
    return %c0_i32, %c0_i32_0 : i32, i32
  }
  func.func @transform_5(%arg0: i32) -> (i32, i32) {
    %c0_i32 = arith.constant 0 : i32
    %c0_i32_0 = arith.constant 0 : i32
    %c0_i32_1 = arith.constant 0 : i32
    return %c0_i32, %c0_i32_0 : i32, i32
  }
  func.func @transform_6(%arg0: i32) -> (i32, i32) {
    %c0_i32 = arith.constant 0 : i32
    %c0_i32_0 = arith.constant 0 : i32
    return %arg0, %c0_i32 : i32, i32
  }
}

</mosaic_0001>

<bundles_post_ra>
// kernel: tpu_custom_call.1
= control target key start
LH: loop header
LB: loop body
LE: loop exit
PB: predicated region body
PF: predicated region fallthrough
CT: control target
= control target key end

     0   :  { %s1023_s0 = inlined_call_operand.hbm [shape: f32[16,32], index: 0, kind: input, shape index: {}]   ;;  %s1024_s1 = inlined_call_operand.hbm [shape: bf16[32,32], index: 1, kind: input, shape index: {}]   ;;  %s1025_s2 = inlined_call_operand.vmem [shape: f32[1,32], index: 2, kind: input, shape index: {}]   ;;  %s1026_s3 = inlined_call_operand.hbm [shape: f32[16,32], index: 3, kind: input, shape index: {}]   ;;  %s1027_s4 = inlined_call_operand.vmem [shape: f32[1,32], index: 4, kind: input, shape index: {}]   ;;  %s1028_s5 = inlined_call_operand.vmem [shape: f32[1,32], index: 5, kind: input, shape index: {}]   ;;  %s1029_s6 = inlined_call_operand.hbm [shape: f32[16,32], index: 6, kind: output, shape index: {}]  }
   0x1   :  { %1032 = sst [smem:[#allocation15_spill]] %s1023_s0 }
   0x2   :  { %1033 = sst [smem:[#allocation16_spill]] %s1024_s1 }
   0x3   :  { %11 = vsyncpa [#allocation3], 0 }
   0x4   :  { %13 = vsyncpa [#allocation3 + $0x1], 0 }
   0x5   :  { %14 = vsyncpa [#allocation6], 0 }
   0x6   :  { %15 = vsyncpa [#allocation4], 0 }
   0x7   :  { %17 = vsyncpa [#allocation4 + $0x1], 0  ;;  %s825_s21 = smov 0   ;;  %s827_s22 = smov 0  }
   0x8   :  { %s829_s23 = smov 0   ;;  %s831_s24 = smov 0  }
   0x9 LB: > { %1034 = sst [smem:[#allocation13_spill]] %s780_s23  ;;  %s846_s25 = sadd.s32 4294967295, %s784_s24   ;;  %s784_s24 = sphi %s831_s24, %s1051_s24   ;;  %s780_s23 = sphi %s829_s23, %s1048_s23   ;;  %s776_s22 = sphi %s827_s22, %s1050_s22   ;;  %s772_s21 = sphi %s825_s21, %s1049_s21  }
   0xa   : > { %s520_s26 = sadd.s32 4294967294, %s784_s24   ;;  %s850_s27 = sadd.s32 1, %s784_s24  }
   0xb   : > { %s30_s28 = sadd.s32 1, %s780_s23  ;;  %s27_s29 = ssub.s32 %s784_s24, %s850_s27 }
   0xc   : > { %p37_p0 = scmp.ne.s32.totalorder %s780_s23, %s776_s22  ;;  %p28_p1 = scmp.eq.s32.totalorder %s27_s29, 0 }
   0xd   : > { %p38_p2 = scmp.eq.s32.totalorder %s784_s24, 0  ;;  %p43_p3 = scmp.ne.s32.totalorder %s776_s22, %s772_s21 }
   0xe   : > { %p177_p4 = scmp.eq.s32.totalorder %s846_s25, 1  ;;  %p183_p6 = scmp.eq.s32.totalorder %s520_s26, 1 }
   0xf   : > { %s862_s30 = scalar_select %p28_p1, %s780_s23, %s30_s28  }
  0x10   : > { %p864_p5 = por %p177_p4, %p37_p0  ;;  %p868_p7 = por %p38_p2, %p37_p0 }
  0x11   : > { %1035 = sst [smem:[#allocation14_spill]] %s862_s30  ;;  %p876_p9 = por %p183_p6, %p43_p3 }
  0x12   : > { %p574_p10 = scmp.lt.s32.totalorder %s784_s24, 2  ;;  %s226_s10 = sand.u32 1, %s784_s24  }
  0x13   : > { %s228_s11 = sand.u32 1, %s780_s23   ;;  %s525_s13 = sshll.u32 %s784_s24, 3 }
  0x14   : > { %s883_s12 = sshll.u32 %s228_s11, 3  ;;  %s1039_s0 = sld [smem:[#allocation15_spill]] }
  0x15   : > { %s230_s18 = scalar_lea.vmem [#allocation2], %s883_s12  ;;  %p892_p11 = pnand %p574_p10, %p868_p7 }
  0x16   : > { %s238_s19 = sshll.u32 %s230_s18, 4  ;;  %p1031_p12 = scmp.eq.s32.totalorder %s846_s25, 0  ;;  %s239_s19 = int_to_ptr.vmem [resolvable:$true] %s238_s19 }
  0x17   : > { %p521_p13 = scmp.ge.s32.totalorder %s784_s24, 1  ;;  %s898_s26 = scalar_lea.sflag [#allocation3], %s226_s10 }
  0x18   : > { %p624_p1 = pneg %p892_p11 }
  0x1a   : > { %s234_s16 = scalar_lea.hbm %s1039_s0, %s525_s13  ;;  %s627_s14 = scalar_lea.hbm %s1039_s0, 16 }
  0x1b   : > { %s236_s17 = sshll.u32 %s234_s16, 4  ;;  %s237_s17 = int_to_ptr.hbm [resolvable:$true] %s236_s17 }
  0x1c   : > { %s620_s28 = sshra.s32 %s237_s17, 4  ;;  %s621_s28 = int_to_ptr.hbm [resolvable:$true] %s620_s28 }
  0x1d   : > { %s622_s29 = scalar_lea.hbm %s621_s28, 8  ;;  %p628_p6 = scmp.lt.s32.totalorder %s621_s28, %s1039_s0 }
  0x1e   : > { %p623_p0 = scmp.ne.s32.totalorder %s621_s28, %s622_s29  ;;  %p629_p7 = scmp.lt.s32.totalorder %s627_s14, %s622_s29 }
  0x20   : > { %p625_p2 = pnand %p624_p1, %p623_p0  ;;  %p630_p10 = por %p629_p7, %p628_p6 }
  0x22   : > { %p626_p4 = pneg %p625_p2 }
  0x24   : > { %p631_p8 = pnand %p630_p10, %p626_p4 }
  0x26   : > { %634 = shalt.err (!%p631_p8)
}
  0x27   : > { %565 = dma.hbm_to_vmem [thread:$0]  (!%p892_p11), %s237_s17, 128, %s239_s19, %s898_s26  }
  0x28   : > { %p919_p0 = por %p1031_p12, %p43_p3  ;;  %p190_p2 = scmp.lt.s32.totalorder %s784_s24, 3 }
  0x29   : > { %s1042_s1 = sld [smem:[#allocation16_spill]]  ;;  %s253_s14 = scalar_lea.hbm %s1026_s3, %s525_s13 }
  0x2a   : > { %p932_p8 = pnand %p521_p13, %p190_p2  ;;  %s786_s17 = smov [#allocation5]  }
  0x2b   : > { %s203_s19 = sshll.u32 %s786_s17, 4  ;;  %s255_s16 = sshll.u32 %s253_s14, 4  ;;  %s204_s19 = int_to_ptr.vmem [resolvable:$true] %s203_s19  ;;  %s256_s16 = int_to_ptr.hbm [resolvable:$true] %s255_s16 }
  0x2c   : > { %p558_p3 = pneg %p932_p8  ;;  %s249_s18 = scalar_lea.vmem [#allocation7], %s883_s12 }
  0x2d   : > { %s257_s28 = sshll.u32 %s249_s18, 4  ;;  %s787_s13 = smov 64   ;;  %s258_s28 = int_to_ptr.vmem [resolvable:$true] %s257_s28 }
  0x2e   : > { %p559_p4 = pnand %p558_p3, %p1031_p12  ;;  %s788_s8 = smov 4  }
  0x2f   : > { %s201_s29 = sshll.u32 %s1042_s1, 4  ;;  %s680_s11 = sshra.s32 %s256_s16, 4  ;;  %s202_s29 = int_to_ptr.hbm [resolvable:$true] %s201_s29  ;;  %s681_s11 = int_to_ptr.hbm [resolvable:$true] %s680_s11 }
  0x30   : > { %561 = dma.hbm_to_vmem [thread:$0]  (!%p559_p4), %s202_s29, 256, %s204_s19, [#allocation6], %s787_s13, %s787_s13, %s788_s8  }
  0x31   : > { %s682_s0 = scalar_lea.hbm %s681_s11, 8  ;;  %s687_s14 = scalar_lea.hbm %s1026_s3, 16 }
  0x32   : > { %p683_p13 = scmp.ne.s32.totalorder %s681_s11, %s682_s0  ;;  %p688_p10 = scmp.lt.s32.totalorder %s681_s11, %s1026_s3 }
  0x33   : > { %p689_p2 = scmp.lt.s32.totalorder %s687_s14, %s682_s0 }
  0x34   : > { %p685_p6 = pnand %p683_p13, %p624_p1 }
  0x35   : > { %p690_p3 = por %p689_p2, %p688_p10 }
  0x36   : > { %p686_p7 = pneg %p685_p6 }
  0x38   : > { %p691_p12 = pnand %p690_p3, %p686_p7 }
  0x3a   : > { %694 = shalt.err (!%p691_p12)
}
  0x3b   : > { %568 = dma.hbm_to_vmem [thread:$0]  (!%p892_p11), %s256_s16, 128, %s258_s28, %s898_s26  }
  0x3c   : > { %266 = sbr.rel (%p932_p8) target bundleno = 481 (0x1e1), region = 44  ;;  %s268_s1 = sand.u32 (!%p932_p8), 1, %s846_s25  }
  0x3d   : > { %s270_s12 = sand.u32 (!%p932_p8), 1, %s776_s22   ;;  %s269_s0 = scalar_lea.sflag (!%p932_p8), [#allocation3], %s268_s1 }
  0x3e   : > { %s959_s23 = sshll.u32 (!%p932_p8), %s270_s12, 3 }
  0x3f   : > { %s272_s30 = scalar_lea.vmem (!%p932_p8), [#allocation2], %s959_s23 }
  0x41   : > { %755 = dma.done.wait (%p919_p0), %s269_s0, 128  }
  0x42   : > { %757 = vsyncadd (%p919_p0), %s269_s0, 4294967168  ;;  %p1044_p11 = scmp.eq.s32.totalorder %s846_s25, 0 }
  0x44   : > { %759 = dma.done.wait (%p1044_p11), [#allocation6], 256   ;;  %p1045_p12 = pmov %p1044_p11 }
  0x45   : > { %s287_s20 = scalar_lea.vmem [#allocation7], %s959_s23 }
  0x46   : > { %761 = vsyncadd (%p1045_p12), [#allocation6], 4294967040 }
  0x47   : > { %763 = dma.done.wait (%p919_p0), %s269_s0, 128  }
  0x48   : > { %765 = vsyncadd (%p919_p0), %s269_s0, 4294967168  ;;  %v547_v0 = vld [vmem:[#allocation5 + $0x8] sm:$0xff]  ;;  %v546_v1 = vld [vmem:[#allocation5] sm:$0xff]  ;;  %vm345_vm0 = vcmask 261120   ;;  %v789_v11 = vmov 32.0   ;;  %s543_s10 = sshll.u32 %s846_s25, 3 }
  0x49   : > { %355 = vmatpush.bf16.msra.mxu0 %v547_v0  ;;  %v323_v2 = vld [vmem:[%s272_s30] sm:$0xff]  ;;  %616 = vrcp.f32 %v789_v11  ;;  %s415_s28 = scalar_lea.hbm %s1029_s6, %s543_s10  ;;  %s321_s25 = scalar_lea.vmem [#allocation8], %s959_s23 }
  0x4a   : > { %v324_v3 = vpack.c.bf16 %v323_v2, %v323_v2  ;;  %v613_v4 = vld [vmem:[%s1025_s2] ss:$0 sm:$0xff]  ;;  %s417_s11 = sshll.u32 %s321_s25, 4  ;;  %s419_s17 = sshll.u32 %s415_s28, 4  ;;  %s418_s11 = int_to_ptr.vmem [resolvable:$true] %s417_s11  ;;  %s420_s17 = int_to_ptr.hbm [resolvable:$true] %s419_s17 }
  0x4b   : > { %v362_v6 = vld [vmem:[%s287_s20] sm:$0xff]  ;;  %s405_s14 = scalar_lea.sflag [#allocation4], %s270_s12  ;;  %s724_s1 = sshra.s32 %s420_s17, 4  ;;  %s725_s1 = int_to_ptr.hbm [resolvable:$true] %s724_s1 }
  0x4c   : > { %v614_v32 = vld [vmem:[%s1027_s4] ss:$0 sm:$0xff]  ;;  %s726_s0 = scalar_lea.hbm %s725_s1, 8  ;;  %s730_s23 = scalar_lea.hbm %s1029_s6, 16 }
  0x4d   : > { %356 = vmatpush.bf16.msra.mxu0 %v546_v1  ;;  %v615_v35 = vld [vmem:[%s1028_s5] ss:$0 sm:$0xff]  ;;  %p727_p1 = scmp.ne.s32.totalorder %s725_s1, %s726_s0  ;;  %p731_p4 = scmp.lt.s32.totalorder %s725_s1, %s1029_s6 }
  0x4e   : > { %p732_p13 = scmp.lt.s32.totalorder %s730_s23, %s726_s0 }
  0x4f   : > { %v617_v12 = vpop.eup %616  ;;  %p728_p0 = pnand %p727_p1, %p864_p5 }
  0x50   : > { %541 = vmatmul.msk.bf16.vlgmr.msra.gmra.mxu0 %vm345_vm0, %v324_v3  ;;  %v368_v13 = vmul.f32 32.0, %v617_v12  ;;  %vm372_vm1 = vweird.f32 %v617_v12  ;;  %p733_p6 = por %p732_p13, %p731_p4 }
  0x51   : > { %p729_p8 = pneg %p728_p0 }
  0x52   : > { %v369_v14 = vsub.f32 1.0, %v368_v13 }
  0x53   : > { %p734_p7 = pnand %p733_p6, %p729_p8 }
  0x54   : > { %v370_v15 = vmul.f32 %v617_v12, %v369_v14 }
  0x56   : > { %v371_v16 = vadd.f32 %v617_v12, %v370_v15 }
  0x58   : > { %v373_v17 = vsel %vm372_vm1, %v617_v12, %v371_v16 }
  0xcd   : > { %v358_v5 = vpop.f32.mrf.mxu0 }
  0xce   : > { %v359_v7 = vadd.f32 %v613_v4, %v358_v5 }
  0xd0   : > { %v363_v8 = vadd.f32 %v362_v6, %v359_v7 }
  0xd2   : > { %v364_v9 = vsel %vm345_vm0, %v363_v8, 0.0 }
  0xd3   : > { %365 = vadd.xlane.f32.xlu0 %v364_v9 }
  0xd5   : > { %v360_v10 = vpop.f32.mrf.mxu0 }
 0x146   : > { %v366_v18 = vpop.xlane.xlu0 %365 }
 0x147   : > { %v374_v19 = vmul.f32 %v373_v17, %v366_v18 }
 0x149   : > { %v375_v20 = vsub.f32 %v363_v8, %v374_v19 }
 0x14b   : > { %v376_v21 = vmul.f32 %v375_v20, %v375_v20 }
 0x14d   : > { %v377_v22 = vsel %vm345_vm0, %v376_v21, 0.0 }
 0x14e   : > { %378 = vadd.xlane.f32.xlu0 %v377_v22 }
 0x1c1   : > { %v379_v23 = vpop.xlane.xlu0 %378 }
 0x1c2   : > { %v380_v24 = vmul.f32 %v379_v23, %v373_v17 }
 0x1c4   : > { %v381_v25 = vadd.f32 1e-12, %v380_v24 }
 0x1c6   : > { %618 = vrsqrt.f32 %v381_v25  ;;  %vm388_vm3 = vweird.f32 %v381_v25 }
 0x1cc   : > { %v619_v26 = vpop.eup %618 }
 0x1cd   : > { %v383_v27 = vmul.f32 %v619_v26, %v381_v25  ;;  %vm389_vm2 = vweird.f32 %v619_v26 }
 0x1ce   : > { %vm390_vm4 = vmor %vm388_vm3, %vm389_vm2 }
 0x1cf   : > { %v384_v28 = vmul.f32 %v619_v26, %v383_v27 }
 0x1d1   : > { %v385_v29 = vmul.f32 0.5, %v384_v28 }
 0x1d3   : > { %v386_v30 = vsub.f32 1.5, %v385_v29 }
 0x1d5   : > { %v387_v31 = vmul.f32 %v619_v26, %v386_v30 }
 0x1d7   : > { %v391_v33 = vsel %vm390_vm4, %v619_v26, %v387_v31 }
 0x1d8   : > { %v392_v34 = vmul.f32 %v391_v33, %v375_v20 }
 0x1da   : > { %v397_v36 = vmul.f32 %v614_v32, %v392_v34 }
 0x1dc   : > { %v402_v37 = vadd.f32 %v615_v35, %v397_v36 }
 0x1de   : > { %403 = vst.msk [vmem:[%s321_s25] sm:$0xff] %vm345_vm0, %v402_v37 }
 0x1df   : > { %737 = shalt.err (!%p734_p7)
}
 0x1e0   : > { %556 = dma.vmem_to_hbm [thread:$0]  (%p864_p5), %s418_s11, 128, %s420_s17, %s405_s14  }
 0x1e1 PF: > { %s431_s12 = sand.u32 1, %s772_s21   ;;  %p1046_p10 = scmp.ge.s32.totalorder %s784_s24, 2 }
 0x1e2   : > { %s432_s10 = scalar_lea.sflag [#allocation4], %s431_s12 }
 0x1e3   : > { %p570_p2 = pnand %p1046_p10, %p876_p9 }
 0x1e5   : > { %p571_p3 = pneg %p570_p2 }
 0x1e7   : > { %767 = dma.done.wait (%p571_p3), %s432_s10, 128  }
 0x1e8   : > { %769 = vsyncadd (%p571_p3), %s432_s10, 4294967168  ;;  %s1047_s15 = sld [smem:[#allocation13_spill]]  ;;  %p20_p11 = scmp.ge.s32.totalorder %s850_s27, 4  }
 0x1e9   : > { %s1048_s23 = sld [smem:[#allocation14_spill]]  ;;  %s1049_s21 = smov %s776_s22 }
 0x1ea   : > { %s1051_s24 = smov %s850_s27  ;;  %22 = sbr.rel (!%p20_p11) target bundleno = 9 (0x9), region = 104 }
 0x1ee   : > { %s1050_s22 = smov %s1047_s15 }
 0x1ef   :  { %438 = vsyncpa [#allocation3], 1 }
 0x1f0   :  { %440 = vsyncpa [#allocation3 + $0x1], 1 }
 0x1f1   :  { %441 = vsyncpa [#allocation6], 1 }
 0x1f2   :  { %442 = vsyncpa [#allocation4], 1 }
 0x1f3   :  { %444 = vsyncpa [#allocation4 + $0x1], 1 }

</bundles_post_ra>
